<compile_context>
chip_gen: v7x
topology: tpu7x:2x2x1
jax: 0.10.0
libtpu: 0.0.40
codegen_flags: <defaults>
</compile_context>

<pallas_src>
import math

import jax
import jax.numpy as jnp
from jax.experimental import pallas as pl
from jax.experimental.pallas import tpu as pltpu


def _dropconnect_kernel(scale_ref, x_ref, o_ref):
    # scale_ref : VMEM (tb, 1)  — per-sample 0 or 1/keep_ratio, in x.dtype
    # x_ref     : VMEM (tb, tn) — lane-dense tile of the flattened sample(s)
    # o_ref     : VMEM (tb, tn)
    o_ref[...] = (x_ref[...] * scale_ref[...]).astype(o_ref.dtype)


def _choose_block(B, N, itemsize, target_bytes=2 << 20):
    """Pick a (tb, tn) block: sublane tile over batch, lane-dense (x128) tile
    over the flattened feature dim, sized to ~2 MiB so double-buffered
    in + out stays well under the scoped-VMEM limit on all TPU generations."""
    tb = B if B <= 8 else 8
    n_padded = pl.cdiv(N, 128) * 128
    if N <= 128:
        tn = N                              # full (small) feature dim
    else:
        tn = max(128, (target_bytes // (tb * itemsize)) // 128 * 128)
        tn = min(tn, n_padded)
    # Amortize per-grid-step overhead (~0.35 us/step) for small samples: grow
    # the batch tile (in multiples of 8) when one lane tile covers the
    # whole feature dim.
    if B > 8 and pl.cdiv(N, tn) == 1:
        while tb * 2 <= B and tb * 2 * tn * itemsize <= target_bytes:
            tb *= 2
    return tb, tn


def drop_connect(x, drop_ratio, key, training=True):
    """JAX/Pallas equivalent of DropConnect(ratio=drop_ratio).forward(x)."""
    if not training:
        return x
    keep_ratio = 1.0 - drop_ratio
    B = x.shape[0]
    N = math.prod(x.shape[1:])
    xf = x.reshape(B, N)
    itemsize = jnp.dtype(x.dtype).itemsize

    # Per-batch uniform randoms (torch.rand analogue; RNG stream differs,
    # semantics match).  Fuse the mask and the 1/keep_ratio scale in the
    # wrapper so the kernel is a pure broadcast-multiply in the native dtype.
    rand = jax.random.uniform(key, (B,), dtype=jnp.float32)
    mask = jnp.floor(keep_ratio + rand)
    scale = (mask * (1.0 / keep_ratio)).astype(x.dtype).reshape(B, 1)

    tb, tn = _choose_block(B, N, itemsize)
    grid = (pl.cdiv(B, tb), pl.cdiv(N, tn))

    out = pl.pallas_call(
        _dropconnect_kernel,
        out_shape=jax.ShapeDtypeStruct((B, N), x.dtype),
        grid=grid,
        in_specs=[
            pl.BlockSpec((tb, 1), lambda i, j: (i, 0)),     # per-sample scale
            pl.BlockSpec((tb, tn), lambda i, j: (i, j)),    # activation tile
        ],
        out_specs=pl.BlockSpec((tb, tn), lambda i, j: (i, j)),
        compiler_params=pltpu.CompilerParams(
            dimension_semantics=("parallel", "parallel"),
        ),
        cost_estimate=pl.CostEstimate(
            flops=B * N,
            transcendentals=0,
            bytes_accessed=2 * B * N * itemsize + B * itemsize,
        ),
    )(scale, xf)
    return out.reshape(x.shape)


if __name__ == "__main__":
    key = jax.random.PRNGKey(0)
    kx, kr = jax.random.split(key)

    B, C, H, W = 2, 4, 16, 16
    drop_ratio = 0.2
    keep_ratio = 1.0 - drop_ratio

    x = jax.random.normal(kx, (B, C, H, W), dtype=jnp.float32)

    y = drop_connect(x, drop_ratio, kr, training=True)
    y = jax.block_until_ready(y)

    # Pure-JAX reference for the correctness check (same RNG draw as kernel).
    rand = jax.random.uniform(kr, (B,), dtype=jnp.float32)
    mask = jnp.floor(keep_ratio + rand).reshape(B, 1, 1, 1)
    y_ref = x / keep_ratio * mask

    assert y.shape == x.shape and y.dtype == x.dtype
    assert jnp.allclose(y, y_ref, atol=1e-6, rtol=1e-6)

    # Eval mode is identity.
    y_eval = jax.block_until_ready(drop_connect(x, drop_ratio, kr, training=False))
    assert jnp.allclose(y_eval, x)

    print("KERNEL_OK")
</pallas_src>

<mosaic_0001>
module attributes {stable_mosaic.version = 11 : i64} {
  func.func @_dropconnect_kernel(%arg0: i32, %arg1: i32, %arg2: memref<2x1xf32, #tpu.memory_space<vmem>>, %arg3: memref<2x1024xf32, #tpu.memory_space<vmem>>, %arg4: memref<2x1024xf32, #tpu.memory_space<vmem>>) attributes {dimension_semantics = [#tpu.dimension_semantics<parallel>, #tpu.dimension_semantics<parallel>], iteration_bounds = array<i64: 1, 1>, scalar_prefetch = 0 : i64, scratch_operands = 0 : i64, tpu.core_type = #tpu.core_type<tc>, window_params = [{transform_indices = @transform_0, window_bounds = array<i64: 2, 1>}, {transform_indices = @transform_1, window_bounds = array<i64: 2, 1024>}, {transform_indices = @transform_2, window_bounds = array<i64: 2, 1024>}]} {
    %c0 = arith.constant 0 : index
    %c0_0 = arith.constant 0 : index
    %0 = vector.load %arg3[%c0, %c0_0] : memref<2x1024xf32, #tpu.memory_space<vmem>>, vector<2x1024xf32>
    %c0_1 = arith.constant 0 : index
    %c0_2 = arith.constant 0 : index
    %1 = vector.load %arg2[%c0_1, %c0_2] : memref<2x1xf32, #tpu.memory_space<vmem>>, vector<2x1xf32>
    %2 = vector.broadcast %1 : vector<2x1xf32> to vector<2x1024xf32>
    %3 = arith.mulf %0, %2 : vector<2x1024xf32>
    %c0_3 = arith.constant 0 : index
    %c0_4 = arith.constant 0 : index
    %4 = vector.load %arg4[%c0_3, %c0_4] : memref<2x1024xf32, #tpu.memory_space<vmem>>, vector<2x1024xf32>
    tpu.vector_store %arg4[%c0_3, %c0_4], %3 {strides = array<i32>} : memref<2x1024xf32, #tpu.memory_space<vmem>>, vector<2x1024xf32>,
    return
  }
  func.func @transform_0(%arg0: i32, %arg1: i32) -> (i32, i32) {
    %c0_i32 = arith.constant 0 : i32
    %c0_i32_0 = arith.constant 0 : i32
    return %arg0, %c0_i32 : i32, i32
  }
  func.func @transform_1(%arg0: i32, %arg1: i32) -> (i32, i32) {
    %c0_i32 = arith.constant 0 : i32
    return %arg0, %arg1 : i32, i32
  }
  func.func @transform_2(%arg0: i32, %arg1: i32) -> (i32, i32) {
    %c0_i32 = arith.constant 0 : i32
    return %arg0, %arg1 : i32, i32
  }
}

</mosaic_0001>

<bundles_post_ra>
// kernel: tpu_custom_call.1
= control target key start
LH: loop header
LB: loop body
LE: loop exit
PB: predicated region body
PF: predicated region fallthrough
CT: control target
= control target key end

     0   :  { %7 = vsyncpa [#allocation3], 0  ;;  %s157_s0 = inlined_call_operand.vmem [shape: f32[2,1], index: 0, kind: input, shape index: {}]   ;;  %s158_s1 = inlined_call_operand.hbm [shape: f32[2,1024], index: 1, kind: input, shape index: {}]   ;;  %s159_s2 = inlined_call_operand.hbm [shape: f32[2,1024], index: 2, kind: output, shape index: {}]  }
   0x1   :  { %8 = vsyncpa [#allocation4], 0  ;;  %s111_s9 = smov [#allocation2]   ;;  %s63_s13 = scalar_lea.hbm %s158_s1, 256 }
   0x2   :  { %s17_s10 = sshll.u32 %s111_s9, 4  ;;  %p64_p0 = scmp.ne.s32.totalorder %s158_s1, %s63_s13  ;;  %s18_s10 = int_to_ptr.vmem [resolvable:$true] %s17_s10 }
   0x3   :  { %p67_p1 = scmp.lt.u32.totalorder %s63_s13, %s158_s1 }
   0x5   :  { %p69_p2 = pnand %p67_p1, %p64_p0 }
   0x7   :  { %72 = shalt.err (!%p69_p2)
}
   0x8   :  { %s73_s18 = scalar_lea.vmem %s18_s10, 256  ;;  %p78_p4 = scmp.lt.s32.totalorder %s18_s10, %s18_s10 }
   0x9   :  { %p74_p3 = scmp.ne.s32.totalorder %s18_s10, %s73_s18  ;;  %p79_p5 = scmp.lt.s32.totalorder %s73_s18, %s73_s18 }
   0xb   :  { %p80_p6 = por %p79_p5, %p78_p4 }
   0xd   :  { %p81_p7 = pnand %p80_p6, %p74_p3 }
   0xf   :  { %84 = shalt.err (!%p81_p7)
}
  0x10   :  { %20 = dma.hbm_to_vmem [thread:$0]  %s158_s1, 256, %s18_s10, [#allocation3]  }
  0x11   :  { %107 = dma.done.wait [#allocation3], 256  }
  0x12   :  { %108 = vsyncadd [#allocation3], 4294967040  ;;  %v112_v0 = vmov 0   ;;  %v26_v1 = vld [vmem:[%s157_s0] sm:$0x3]  ;;  %v34_v4 = vlaneseq  ;;  %v25_v10 = vld [vmem:[#allocation2 + $0x8] sm:$0xff] }
  0x13   :  { %62 = vset.pattern.permute.xlu0 %v112_v0  ;;  %v113_v2 = vmov 269488144   ;;  %v24_v9 = vld [vmem:[#allocation2] sm:$0xff]  ;;  %s114_s23 = smov [#allocation5]  }
  0x14   :  { %29 = vperm.xlu0 %62, %v26_v1   ;;  %v32_v3 = vunpack.c.l.s4 %v113_v2  ;;  %v35_v6 = vshrl.u32 %v34_v4, 7  ;;  %s49_s1 = sshll.u32 %s114_s23, 4  ;;  %s50_s1 = int_to_ptr.vmem [resolvable:$true] %s49_s1 }
  0x15   :  { %s85_s24 = scalar_lea.vmem %s50_s1, 256  ;;  %p90_p9 = scmp.lt.s32.totalorder %s50_s1, %s50_s1 }
  0x16   :  { %v33_v5 = vunpack.c.0.s8 %v32_v3  ;;  %p86_p8 = scmp.ne.s32.totalorder %s50_s1, %s85_s24  ;;  %p91_p10 = scmp.lt.s32.totalorder %s85_s24, %s85_s24 }
  0x18   :  { %v36_v7 = vsub.s32 %v33_v5, %v35_v6  ;;  %p92_p11 = por %p91_p10, %p90_p9 }
  0x1a   :  { %p93_p12 = pnand %p92_p11, %p86_p8 }
  0x93   :  { %v30_v8 = vpop.permute.xlu0 %29 }
  0x94   :  { %v37_v11 = vrot.slane %v30_v8, %v36_v7 }
  0x96   :  { %v39_v12 = vmul.f32 %v37_v11, %v24_v9  ;;  %v40_v13 = vmul.f32 %v37_v11, %v25_v10 }
  0x98   :  { %41 = vst [vmem:[#allocation5] sm:$0xff] %v39_v12  ;;  %42 = vst [vmem:[#allocation5 + $0x8] sm:$0xff] %v40_v13 }
  0x99   :  { %96 = shalt.err (!%p93_p12)
}
  0x9a   :  { %s97_s26 = scalar_lea.hbm %s159_s2, 256 }
  0x9b   :  { %p98_p13 = scmp.ne.s32.totalorder %s159_s2, %s97_s26  ;;  %p101_p0 = scmp.lt.u32.totalorder %s97_s26, %s159_s2 }
  0x9d   :  { %p103_p1 = pnand %p101_p0, %p98_p13 }
  0x9f   :  { %106 = shalt.err (!%p103_p1)
}
  0xa0   :  { %52 = dma.vmem_to_hbm [thread:$0]  %s50_s1, 256, %s159_s2, [#allocation4]  }
  0xa1   :  { %109 = dma.done.wait [#allocation4], 256  }
  0xa2   :  { %110 = vsyncadd [#allocation4], 4294967040 }
  0xa3   :  { %56 = vsyncpa [#allocation3], 1 }
  0xa4   :  { %57 = vsyncpa [#allocation4], 1 }

</bundles_post_ra>
